<compile_context>
chip_gen: v7x
topology: tpu7x:2x2x1
jax: 0.10.0
libtpu: 0.0.40
codegen_flags: <defaults>
</compile_context>

<pallas_src>
import functools

import jax
import jax.numpy as jnp
from jax.experimental import pallas as pl
from jax.experimental.pallas import tpu as pltpu


def _tscv_kernel(x_ref, w_ref, o_ref, *, size):
    x = x_ref[...].astype(jnp.float32)           # (TR, S)
    w = w_ref[...]                               # (S, T_pad) banded 0/1 matrix

    # Pre-center each row by its mean over S: keeps sumsq - n*mean^2 free of
    # catastrophic cancellation when |mean| >> std while preserving the exact
    # two-pass variance semantics of the reference.
    c = jnp.mean(x, axis=1, keepdims=True)       # (TR, 1)
    xc = x - c

    # All window sums at once on the MXU (lane-dense over T_pad).
    sums = jnp.dot(xc, w, preferred_element_type=jnp.float32,
                   precision=jax.lax.Precision.HIGHEST)            # (TR, T_pad)
    sumsq = jnp.dot(xc * xc, w, preferred_element_type=jnp.float32,
                    precision=jax.lax.Precision.HIGHEST)           # (TR, T_pad)

    inv_n = 1.0 / size
    mean_c = sums * inv_n                        # window mean of centered data
    var = (sumsq - size * mean_c * mean_c) * (1.0 / (size - 1))
    var = jnp.maximum(var, 0.0)                  # clamp tiny negative residuals
    mean = mean_c + c                            # true per-window mean
    # Single unmasked, lane-dense store of the full padded slab.
    o_ref[...] = jnp.sqrt(var) / mean


def _pick_block_rows(S, T_pad, itemsize, budget_bytes=24 * 1024 * 1024):
    # Fit comfortably inside the default scoped VMEM on every generation
    # (v7x has only 64 MiB physical / 32 MiB default scoped): double-buffered
    # input + output tiles per step, plus the resident W operand.
    w_bytes = 2 * S * T_pad * 4
    per_row = 2 * S * itemsize + 2 * T_pad * 4
    tr = (budget_bytes - w_bytes) // max(per_row, 1)
    tr = max(16, min(1024, tr))
    tr = (tr // 16) * 16          # multiple of 16: valid sublane tile for f32 & bf16
    return tr


def ts_cv(x, size=20, stride=1):
    B, F, S = x.shape
    T = (S - size) // stride + 1
    assert T >= 1, "seq_length must be >= size"
    R = B * F
    x2d = x.reshape(R, S)          # keep native dtype; kernel upcasts on load

    # Pad the window axis to an MXU/lane-friendly multiple of 128.
    T_pad = ((T + 127) // 128) * 128

    # Static banded window matrix: W[s, t] = 1 iff s in [t*stride, t*stride+size),
    # zeroed for padded columns t >= T.
    s_idx = jnp.arange(S, dtype=jnp.int32)[:, None]
    t_idx = jnp.arange(T_pad, dtype=jnp.int32)[None, :]
    start = t_idx * stride
    w = ((s_idx >= start) & (s_idx < start + size) & (t_idx < T)).astype(jnp.float32)

    tr = _pick_block_rows(S, T_pad, x2d.dtype.itemsize)
    TR = R if R <= tr else tr      # full-dim block is always legal for small R
    grid = (pl.cdiv(R, TR),)

    out_pad = pl.pallas_call(
        functools.partial(_tscv_kernel, size=size),
        out_shape=jax.ShapeDtypeStruct((R, T_pad), jnp.float32),
        grid=grid,
        in_specs=[
            pl.BlockSpec((TR, S), lambda i: (i, 0)),
            pl.BlockSpec((S, T_pad), lambda i: (0, 0)),   # W resident, DMA'd once
        ],
        out_specs=pl.BlockSpec((TR, T_pad), lambda i: (i, 0)),
        compiler_params=pltpu.CompilerParams(
            dimension_semantics=("parallel",)),            # megacore sharding
    )(x2d, w)
    # Drop lane padding outside the kernel (cheap XLA slice), restore (B, F, T).
    return out_pad[:, :T].reshape(B, F, T)


def _ts_cv_ref(x, size=20, stride=1):
    # Pure-JAX reference mirroring the PyTorch loop.
    B, F, S = x.shape
    T = (S - size) // stride + 1
    outs = []
    for t in range(T):
        seg = x[:, :, t * stride:t * stride + size]
        mean = seg.mean(axis=2, keepdims=True)
        cen = seg - mean
        std = jnp.sqrt((cen ** 2).sum(axis=2) / (size - 1))
        outs.append(std / mean[..., 0])
    return jnp.stack(outs, axis=2)


if __name__ == "__main__":
    key = jax.random.PRNGKey(0)
    B, F, S = 2, 4, 32
    size, stride = 20, 1           # module defaults -> T = 13
    # Shift away from zero mean so cv is well-conditioned.
    x = jax.random.normal(key, (B, F, S), dtype=jnp.float32) + 3.0

    out = ts_cv(x, size=size, stride=stride)
    out = jax.block_until_ready(out)

    ref = _ts_cv_ref(x, size=size, stride=stride)
    assert out.shape == (B, F, (S - size) // stride + 1)
    assert jnp.allclose(out, ref, rtol=1e-4, atol=1e-5)

    print("KERNEL_OK")
</pallas_src>

<mosaic_0001>
module attributes {stable_mosaic.version = 11 : i64} {
  func.func @_tscv_kernel(%arg0: i32, %arg1: memref<8x32xf32, #tpu.memory_space<vmem>>, %arg2: memref<32x128xf32, #tpu.memory_space<vmem>>, %arg3: memref<8x128xf32, #tpu.memory_space<vmem>>) attributes {dimension_semantics = [#tpu.dimension_semantics<parallel>], iteration_bounds = array<i64: 1>, scalar_prefetch = 0 : i64, scratch_operands = 0 : i64, tpu.core_type = #tpu.core_type<tc>, window_params = [{transform_indices = @transform_0, window_bounds = array<i64: 8, 32>}, {pipeline_mode = #tpu.pipeline_mode<synchronous>, transform_indices = @transform_1, window_bounds = array<i64: 32, 128>}, {transform_indices = @transform_2, window_bounds = array<i64: 8, 128>}]} {
    %c0 = arith.constant 0 : index
    %c0_0 = arith.constant 0 : index
    %0 = vector.load %arg1[%c0, %c0_0] : memref<8x32xf32, #tpu.memory_space<vmem>>, vector<8x32xf32>
    %c0_1 = arith.constant 0 : index
    %c0_2 = arith.constant 0 : index
    %1 = vector.load %arg2[%c0_1, %c0_2] : memref<32x128xf32, #tpu.memory_space<vmem>>, vector<32x128xf32>
    %cst = arith.constant dense<0.000000e+00> : vector<8xf32>
    %2 = vector.multi_reduction <add>, %0, %cst [1] : vector<8x32xf32> to vector<8xf32>
    %3 = vector.shape_cast %2 : vector<8xf32> to vector<8x1xf32>
    %cst_3 = arith.constant 3.200000e+01 : f32
    %4 = vector.broadcast %cst_3 : f32 to vector<8x1xf32>
    %5 = arith.divf %3, %4 : vector<8x1xf32>
    %6 = vector.broadcast %5 : vector<8x1xf32> to vector<8x32xf32>
    %7 = arith.subf %0, %6 : vector<8x32xf32>
    %cst_4 = arith.constant dense<0.000000e+00> : vector<8x128xf32>
    %8 = tpu.matmul %7, %1, %cst_4 {dimension_numbers = #tpu.dot_dimension_numbers<[1], [0], [0], [1], [0, 0, 1, 1], [], []>, precision = #tpu.contract_precision<fp32>} : vector<8x32xf32>, vector<32x128xf32>, vector<8x128xf32> -> vector<8x128xf32>
    %9 = arith.mulf %7, %7 : vector<8x32xf32>
    %cst_5 = arith.constant dense<0.000000e+00> : vector<8x128xf32>
    %10 = tpu.matmul %9, %1, %cst_5 {dimension_numbers = #tpu.dot_dimension_numbers<[1], [0], [0], [1], [0, 0, 1, 1], [], []>, precision = #tpu.contract_precision<fp32>} : vector<8x32xf32>, vector<32x128xf32>, vector<8x128xf32> -> vector<8x128xf32>
    %cst_6 = arith.constant 5.000000e-02 : f32
    %11 = vector.broadcast %cst_6 : f32 to vector<8x128xf32>
    %12 = arith.mulf %8, %11 : vector<8x128xf32>
    %cst_7 = arith.constant 2.000000e+01 : f32
    %13 = vector.broadcast %cst_7 : f32 to vector<8x128xf32>
    %14 = arith.mulf %13, %12 : vector<8x128xf32>
    %15 = arith.mulf %14, %12 : vector<8x128xf32>
    %16 = arith.subf %10, %15 : vector<8x128xf32>
    %cst_8 = arith.constant 0.0526315793 : f32
    %17 = vector.broadcast %cst_8 : f32 to vector<8x128xf32>
    %18 = arith.mulf %16, %17 : vector<8x128xf32>
    %cst_9 = arith.constant 0.000000e+00 : f32
    %19 = vector.broadcast %cst_9 : f32 to vector<8x128xf32>
    %20 = arith.maximumf %18, %19 : vector<8x128xf32>
    %21 = vector.broadcast %5 : vector<8x1xf32> to vector<8x128xf32>
    %22 = arith.addf %12, %21 : vector<8x128xf32>
    %23 = math.sqrt %20 : vector<8x128xf32>
    %24 = arith.divf %23, %22 : vector<8x128xf32>
    %c0_10 = arith.constant 0 : index
    %c0_11 = arith.constant 0 : index
    %25 = vector.load %arg3[%c0_10, %c0_11] : memref<8x128xf32, #tpu.memory_space<vmem>>, vector<8x128xf32>
    tpu.vector_store %arg3[%c0_10, %c0_11], %24 {strides = array<i32>} : memref<8x128xf32, #tpu.memory_space<vmem>>, vector<8x128xf32>,
    return
  }
  func.func @transform_0(%arg0: i32) -> (i32, i32) {
    %c0_i32 = arith.constant 0 : i32
    %c0_i32_0 = arith.constant 0 : i32
    return %arg0, %c0_i32 : i32, i32
  }
  func.func @transform_1(%arg0: i32) -> (i32, i32) {
    %c0_i32 = arith.constant 0 : i32
    %c0_i32_0 = arith.constant 0 : i32
    %c0_i32_1 = arith.constant 0 : i32
    return %c0_i32, %c0_i32_0 : i32, i32
  }
  func.func @transform_2(%arg0: i32) -> (i32, i32) {
    %c0_i32 = arith.constant 0 : i32
    %c0_i32_0 = arith.constant 0 : i32
    return %arg0, %c0_i32 : i32, i32
  }
}

</mosaic_0001>

<bundles_post_ra>
// kernel: tpu_custom_call.1
= control target key start
LH: loop header
LB: loop body
LE: loop exit
PB: predicated region body
PF: predicated region fallthrough
CT: control target
= control target key end

     0   :  { %7 = vsyncpa [#allocation3], 0  ;;  %s1577_s0 = inlined_call_operand.hbm [shape: f32[8,32], index: 0, kind: input, shape index: {}]   ;;  %s1578_s1 = inlined_call_operand.hbm [shape: f32[32,128], index: 1, kind: input, shape index: {}]   ;;  %s1579_s2 = inlined_call_operand.hbm [shape: f32[8,128], index: 2, kind: output, shape index: {}]  }
   0x1   :  { %8 = vsyncpa [#allocation6], 0 }
   0x2   :  { %9 = vsyncpa [#allocation4], 0  ;;  %s1428_s9 = smov [#allocation2]   ;;  %s1429_s11 = smov [#allocation5]  }
   0x3   :  { %s16_s10 = sshll.u32 %s1428_s9, 4  ;;  %s25_s12 = sshll.u32 %s1429_s11, 4  ;;  %s17_s10 = int_to_ptr.vmem [resolvable:$true] %s16_s10  ;;  %s1451_s12 = int_to_ptr.vmem [resolvable:$true] %s25_s12 }
   0x4   :  { %s1356_s15 = scalar_lea.hbm %s1577_s0, 128 }
   0x5   :  { %p1357_p0 = scmp.ne.s32.totalorder %s1577_s0, %s1356_s15  ;;  %p1360_p1 = scmp.lt.u32.totalorder %s1356_s15, %s1577_s0 }
   0x7   :  { %p1362_p2 = pnand %p1360_p1, %p1357_p0 }
   0x9   :  { %1365 = shalt.err (!%p1362_p2)
}
   0xa   :  { %s1366_s20 = scalar_lea.vmem %s17_s10, 128  ;;  %p1371_p4 = scmp.lt.s32.totalorder %s17_s10, %s17_s10 }
   0xb   :  { %p1367_p3 = scmp.ne.s32.totalorder %s17_s10, %s1366_s20  ;;  %p1372_p5 = scmp.lt.s32.totalorder %s1366_s20, %s1366_s20 }
   0xd   :  { %p1373_p6 = por %p1372_p5, %p1371_p4 }
   0xf   :  { %p1374_p7 = pnand %p1373_p6, %p1367_p3 }
  0x11   :  { %1377 = shalt.err (!%p1374_p7)
}
  0x12   :  { %19 = dma.hbm_to_vmem [thread:$0]  %s1577_s0, 128, %s17_s10, [#allocation3]  }
  0x13   :  { %s1378_s25 = scalar_lea.hbm %s1578_s1, 512 }
  0x14   :  { %p1379_p8 = scmp.ne.s32.totalorder %s1578_s1, %s1378_s25  ;;  %p1382_p9 = scmp.lt.u32.totalorder %s1378_s25, %s1578_s1 }
  0x16   :  { %p1384_p10 = pnand %p1382_p9, %p1379_p8 }
  0x18   :  { %1387 = shalt.err (!%p1384_p10)
}
  0x19   :  { %s1388_s30 = scalar_lea.vmem %s1451_s12, 512  ;;  %p1393_p12 = scmp.lt.s32.totalorder %s1451_s12, %s1451_s12 }
  0x1a   :  { %p1389_p11 = scmp.ne.s32.totalorder %s1451_s12, %s1388_s30  ;;  %p1394_p13 = scmp.lt.s32.totalorder %s1388_s30, %s1388_s30 }
  0x1c   :  { %p1395_p0 = por %p1394_p13, %p1393_p12 }
  0x1e   :  { %p1396_p1 = pnand %p1395_p0, %p1389_p11 }
  0x20   :  { %1399 = shalt.err (!%p1396_p1)
}
  0x21   :  { %s1430_s0 = smov 128   ;;  %s1431_s3 = smov 8  }
  0x22   :  { %31 = dma.hbm_to_vmem [thread:$0]  %s1578_s1, 512, %s1451_s12, [#allocation6], %s1430_s0, %s1430_s0, %s1431_s3  }
  0x23   :  { %1422 = dma.done.wait [#allocation3], 128  }
  0x24   :  { %1423 = vsyncadd [#allocation3], 4294967168 }
  0x25   :  { %1424 = dma.done.wait [#allocation6], 512  }
  0x26   :  { %1425 = vsyncadd [#allocation6], 4294966784  ;;  %vm43_vm0 = vcmask 261120   ;;  %v38_v0 = vld [vmem:[#allocation2] sm:$0xff]  ;;  %v39_v2 = vld [vmem:[#allocation5] sm:$0xff]  ;;  %v1432_v9 = vmov 0.0|0.0  }
  0x27   :  { %v44_v1 = vsel %vm43_vm0, %v38_v0, 0.0  ;;  %v40_v3 = vld [vmem:[#allocation5 + $0x8] sm:$0xff]  ;;  %v54_v4 = vand.u32 4294901760, %v39_v2  ;;  %1252 = vmatprep.subr.bf16.mxu0 %v1432_v9  ;;  %1288 = vmatprep.subr.bf16.mxu1 %v1432_v9  ;;  %v41_v10 = vld [vmem:[#allocation5 + $0x10] sm:$0xff]  ;;  %v42_v11 = vld [vmem:[#allocation5 + $0x18] sm:$0xff]  ;;  %vm1433_vm1 = vmmov 0  }
  0x28   :  { %45 = vadd.xlane.f32.xlu0 %v44_v1  ;;  %v57_v5 = vand.u32 4294901760, %v40_v3  ;;  %v60_v12 = vand.u32 4294901760, %v41_v10  ;;  %v63_v13 = vand.u32 4294901760, %v42_v11  ;;  %v1434_v17 = vmov 0.0   ;;  %s1435_s1 = smov [#allocation7]  }
  0x29   :  { %v134_v7 = vsub.f32 %v39_v2, %v54_v4  ;;  %1128 = vmatprep.mubr.msk.f32.mxu0 %vm1433_vm1, %v1434_v17  ;;  %1194 = vmatprep.mubr.msk.f32.mxu1 %vm1433_vm1, %v1434_v17  ;;  %s1050_s6 = sshll.u32 %s1435_s1, 4  ;;  %s1051_s6 = int_to_ptr.vmem [resolvable:$true] %s1050_s6 }
  0x2a   :  { %v1483_v6 = vpack.c.bf16 %v57_v5, %v54_v4  ;;  %v141_v8 = vsub.f32 %v40_v3, %v57_v5  ;;  %v1491_v16 = vpack.c.bf16 %v63_v13, %v60_v12  ;;  %v148_v20 = vsub.f32 %v41_v10, %v60_v12  ;;  %s1400_s7 = scalar_lea.vmem %s1051_s6, 128  ;;  %p1405_p3 = scmp.lt.s32.totalorder %s1051_s6, %s1051_s6 }
  0x2b   :  { %v135_v14 = vand.u32 4294901760, %v134_v7  ;;  %v155_v21 = vsub.f32 %v42_v11, %v63_v13  ;;  %p1401_p2 = scmp.ne.s32.totalorder %s1051_s6, %s1400_s7  ;;  %p1406_p4 = scmp.lt.s32.totalorder %s1400_s7, %s1400_s7 }
  0x2c   :  { %1254 = vmatpush3.bf16.msra.mxu0 %v1483_v6  ;;  %1290 = vmatpush3.bf16.msra.mxu1 %v1483_v6  ;;  %v142_v15 = vand.u32 4294901760, %v141_v8  ;;  %v149_v24 = vand.u32 4294901760, %v148_v20  ;;  %v1265_v32 = vpack.c.bf16 %v141_v8, %v134_v7 }
  0x2d   :  { %1255 = vmatprep.subr.bf16.mxu0 %v1432_v9  ;;  %1291 = vmatprep.subr.bf16.mxu1 %v1432_v9  ;;  %v136_v18 = vsub.f32 %v134_v7, %v135_v14  ;;  %v156_v25 = vand.u32 4294901760, %v155_v21  ;;  %v1268_v33 = vpack.c.bf16 %v155_v21, %v148_v20  ;;  %p1407_p5 = por %p1406_p4, %p1405_p3 }
  0x2e   :  { %v143_v19 = vsub.f32 %v141_v8, %v142_v15  ;;  %v150_v27 = vsub.f32 %v148_v20, %v149_v24  ;;  %v1277_v34 = vpack.c.bf16 %v142_v15, %v135_v14 }
  0x2f   :  { %v137_v22 = vand.u32 4294901760, %v136_v18  ;;  %v157_v28 = vsub.f32 %v155_v21, %v156_v25  ;;  %v1280_v35 = vpack.c.bf16 %v156_v25, %v149_v24  ;;  %p1408_p6 = pnand %p1407_p5, %p1401_p2 }
  0x30   :  { %1257 = vmatpush3.bf16.msra.mxu0 %v1491_v16  ;;  %1293 = vmatpush3.bf16.msra.mxu1 %v1491_v16  ;;  %v144_v23 = vand.u32 4294901760, %v143_v19  ;;  %v151_v29 = vand.u32 4294901760, %v150_v27 }
  0x31   :  { %1258 = vmatprep.subr.bf16.mxu0 %v1432_v9  ;;  %1294 = vmatprep.subr.bf16.mxu1 %v1432_v9  ;;  %v158_v30 = vand.u32 4294901760, %v157_v28 }
  0x32   :  { %v1259_v26 = vpack.c.bf16 %v144_v23, %v137_v22 }
  0x33   :  { %v1262_v31 = vpack.c.bf16 %v158_v30, %v151_v29 }
  0xb5   :  { %v46_v36 = vpop.xlane.xlu0 %45 }
  0xb6   :  { %v1501_v37 = vmul.f32 0.03125, %v46_v36 }
  0xb8   :  { %v49_v38 = vsub.f32 %v38_v0, %v1501_v37 }
  0xba   :  { %v51_v39 = vsel %vm43_vm0, %v49_v38, 0  ;;  %v538_v40 = vmul.f32 %v49_v38, %v49_v38 }
  0xbb   :  { %v1505_v41 = vand.u32 4294901760, %v51_v39 }
  0xbc   :  { %v540_v42 = vsel %vm43_vm0, %v538_v40, 0 }
  0xbd   :  { %v123_v43 = vsub.f32 %v51_v39, %v1505_v41  ;;  %v1509_v44 = vand.u32 4294901760, %v540_v42 }
  0xbf   :  { %v612_v45 = vsub.f32 %v540_v42, %v1509_v44  ;;  %v124_v46 = vand.u32 4294901760, %v123_v43 }
  0xc1   :  { %v125_v47 = vsub.f32 %v123_v43, %v124_v46  ;;  %v613_v48 = vand.u32 4294901760, %v612_v45 }
  0xc3   :  { %v126_v49 = vand.u32 4294901760, %v125_v47  ;;  %v614_v50 = vsub.f32 %v612_v45, %v613_v48 }
  0xc5   :  { %1129 = vmatmul.mubr.f32.vlgmr.msra.gmra.mrb[0].mxu0 %v126_v49  ;;  %v615_v51 = vand.u32 4294901760, %v614_v50 }
  0xc6   :  { %1260 = vmatpush3.bf16.msra.mxu0 %v1259_v26  ;;  %1139 = vmatprep.mubr.msk.f32.mxu0 %vm1433_vm1, %v1434_v17 }
  0xc7   :  { %1195 = vmatmul.mubr.f32.vlgmr.msra.gmra.mrb[0].mxu1 %v615_v51  ;;  %1261 = vmatprep.subr.bf16.mxu0 %v1432_v9 }
  0xc8   :  { %1296 = vmatpush3.bf16.msra.mxu1 %v1259_v26  ;;  %1205 = vmatprep.mubr.msk.f32.mxu1 %vm1433_vm1, %v1434_v17 }
  0xc9   :  { %1297 = vmatprep.subr.bf16.mxu1 %v1432_v9 }
  0xca   :  { %1263 = vmatpush3.bf16.msra.mxu0 %v1262_v31 }
  0xcb   :  { %1264 = vmatprep.subr.bf16.mxu0 %v1432_v9 }
  0xcc   :  { %1299 = vmatpush3.bf16.msra.mxu1 %v1262_v31 }
  0xcd   :  { %1140 = vmatmul.mubr.f32.vlgmr.msra.gmra.mrb[0].mxu0 %v1505_v41  ;;  %1300 = vmatprep.subr.bf16.mxu1 %v1432_v9 }
  0xce   :  { %1266 = vmatpush3.bf16.msra.mxu0 %v1265_v32  ;;  %1150 = vmatprep.mubr.msk.f32.mxu0 %vm1433_vm1, %v1434_v17 }
  0xcf   :  { %1206 = vmatmul.mubr.f32.vlgmr.msra.gmra.mrb[0].mxu1 %v1509_v44  ;;  %1267 = vmatprep.subr.bf16.mxu0 %v1432_v9 }
  0xd0   :  { %1302 = vmatpush3.bf16.msra.mxu1 %v1265_v32  ;;  %1216 = vmatprep.mubr.msk.f32.mxu1 %vm1433_vm1, %v1434_v17 }
  0xd1   :  { %1303 = vmatprep.subr.bf16.mxu1 %v1432_v9 }
  0xd2   :  { %1269 = vmatpush3.bf16.msra.mxu0 %v1268_v33 }
  0xd3   :  { %1270 = vmatprep.subr.bf16.mxu0 %v1432_v9 }
  0xd4   :  { %1305 = vmatpush3.bf16.msra.mxu1 %v1268_v33 }
  0xd5   :  { %1151 = vmatmul.mubr.f32.vlgmr.msra.gmra.mrb[0].mxu0 %v123_v43  ;;  %1306 = vmatprep.subr.bf16.mxu1 %v1432_v9 }
  0xd6   :  { %1272 = vmatpush3.bf16.msra.mxu0 %v1483_v6  ;;  %1161 = vmatprep.mubr.msk.f32.mxu0 %vm1433_vm1, %v1434_v17 }
  0xd7   :  { %1217 = vmatmul.mubr.f32.vlgmr.msra.gmra.mrb[0].mxu1 %v612_v45  ;;  %1273 = vmatprep.subr.bf16.mxu0 %v1432_v9 }
  0xd8   :  { %1308 = vmatpush3.bf16.msra.mxu1 %v1483_v6  ;;  %1227 = vmatprep.mubr.msk.f32.mxu1 %vm1433_vm1, %v1434_v17 }
  0xd9   :  { %1309 = vmatprep.subr.bf16.mxu1 %v1432_v9 }
  0xda   :  { %1275 = vmatpush3.bf16.msra.mxu0 %v1491_v16 }
  0xdb   :  { %1276 = vmatprep.subr.bf16.mxu0 %v1432_v9 }
  0xdc   :  { %1311 = vmatpush3.bf16.msra.mxu1 %v1491_v16 }
  0xdd   :  { %1162 = vmatmul.mubr.f32.vlgmr.msra.gmra.mrb[0].mxu0 %v124_v46  ;;  %1312 = vmatprep.subr.bf16.mxu1 %v1432_v9 }
  0xde   :  { %1278 = vmatpush3.bf16.msra.mxu0 %v1277_v34  ;;  %1172 = vmatprep.mubr.msk.f32.mxu0 %vm1433_vm1, %v1434_v17 }
  0xdf   :  { %1228 = vmatmul.mubr.f32.vlgmr.msra.gmra.mrb[0].mxu1 %v613_v48  ;;  %1279 = vmatprep.subr.bf16.mxu0 %v1432_v9 }
  0xe0   :  { %1314 = vmatpush3.bf16.msra.mxu1 %v1277_v34  ;;  %1238 = vmatprep.mubr.msk.f32.mxu1 %vm1433_vm1, %v1434_v17 }
  0xe1   :  { %1315 = vmatprep.subr.bf16.mxu1 %v1432_v9 }
  0xe2   :  { %1281 = vmatpush3.bf16.msra.mxu0 %v1280_v35 }
  0xe3   :  { %1282 = vmatprep.subr.bf16.mxu0 %v1432_v9 }
  0xe4   :  { %1317 = vmatpush3.bf16.msra.mxu1 %v1280_v35 }
  0xe5   :  { %1173 = vmatmul.mubr.f32.vlgmr.msra.gmra.mrb[0].mxu0 %v1505_v41  ;;  %1318 = vmatprep.subr.bf16.mxu1 %v1432_v9 }
  0xe6   :  { %1284 = vmatpush3.bf16.msra.mxu0 %v1483_v6  ;;  %1183 = vmatprep.mubr.msk.f32.mxu0 %vm1433_vm1, %v1434_v17 }
  0xe7   :  { %1239 = vmatmul.mubr.f32.vlgmr.msra.gmra.mrb[0].mxu1 %v1509_v44  ;;  %1285 = vmatprep.subr.bf16.mxu0 %v1432_v9 }
  0xe8   :  { %1320 = vmatpush3.bf16.msra.mxu1 %v1483_v6  ;;  %1249 = vmatprep.mubr.msk.f32.mxu1 %vm1433_vm1, %v1434_v17 }
  0xe9   :  { %1321 = vmatprep.subr.bf16.mxu1 %v1432_v9 }
  0xea   :  { %1287 = vmatpush3.bf16.msra.mxu0 %v1491_v16 }
  0xec   :  { %1323 = vmatpush3.bf16.msra.mxu1 %v1491_v16 }
  0xed   :  { %1184 = vmatmul.mubr.f32.vlgmr.msra.gmra.mrb[0].mxu0 %v1505_v41 }
  0xef   :  { %1250 = vmatmul.mubr.f32.vlgmr.msra.gmra.mrb[0].mxu1 %v1509_v44 }
 0x1c0   :  { %v534_v52 = vpop.f32.mrb[0].mxu0 }
 0x1c1   :  { %v1027_v53 = vmul.f32 0.05, %v534_v52  ;;  %v1185_v54 = vpop.f32.mrb[1].mxu0 }
 0x1c2   :  { %v1023_v55 = vpop.f32.mrb[0].mxu1 }
 0x1c3   :  { %v1028_v56 = vmul.f32 20.0, %v1027_v53  ;;  %v1251_v57 = vpop.f32.mrb[1].mxu1  ;;  %v1033_v62 = vadd.f32 %v1027_v53, %v1501_v37 }
 0x1c5   :  { %v1029_v58 = vmul.f32 %v1028_v56, %v1027_v53 }
 0x1c7   :  { %v1030_v59 = vsub.f32 %v1023_v55, %v1029_v58 }
 0x1c9   :  { %v1031_v60 = vmul.f32 0.05263158, %v1030_v59 }
 0x1cb   :  { %v1032_v61 = vmax.f32 %v1031_v60, 0.0 }
 0x1cd   :  { %1352 = vrsqrt.f32 %v1032_v61  ;;  %vm1036_vm2 = vcmp.eq.f32.partialorder %v1032_v61, inf  ;;  %v1039_v1 = vand.u32 2147483648, %v1032_v61  ;;  %vm1038_vm3 = vcmp.eq.f32.partialorder %v1032_v61, 0.0 }
 0x1ce   :  { %1354 = vrcp.f32 %v1033_v62 }
 0x1d7   :  { %v1353_v63 = vpop.eup %1352 }
 0x1d8   :  { %v1035_v0 = vmul.f32 %v1353_v63, %v1032_v61  ;;  %v1355_v3 = vpop.eup %1354 }
 0x1da   :  { %v1037_v2 = vsel %vm1036_vm2, %v1032_v61, %v1035_v0 }
 0x1db   :  { %v1040_v4 = vsel %vm1038_vm3, %v1039_v1, %v1037_v2 }
 0x1dc   :  { %v1042_v5 = vmul.f32 %v1355_v3, %v1040_v4 }
 0x1de   :  { %1043 = vst [vmem:[#allocation7] sm:$0xff] %v1042_v5 }
 0x1df   :  { %1411 = shalt.err (!%p1408_p6)
}
 0x1e0   :  { %s1412_s10 = scalar_lea.hbm %s1579_s2, 128 }
 0x1e1   :  { %p1413_p7 = scmp.ne.s32.totalorder %s1579_s2, %s1412_s10  ;;  %p1416_p8 = scmp.lt.u32.totalorder %s1412_s10, %s1579_s2 }
 0x1e3   :  { %p1418_p9 = pnand %p1416_p8, %p1413_p7 }
 0x1e5   :  { %1421 = shalt.err (!%p1418_p9)
}
 0x1e6   :  { %1053 = dma.vmem_to_hbm [thread:$0]  %s1051_s6, 128, %s1579_s2, [#allocation4]  }
 0x1e7   :  { %1426 = dma.done.wait [#allocation4], 128  }
 0x1e8   :  { %1427 = vsyncadd [#allocation4], 4294967168 }
 0x1e9   :  { %1057 = vsyncpa [#allocation3], 1 }
 0x1ea   :  { %1058 = vsyncpa [#allocation6], 1 }
 0x1eb   :  { %1059 = vsyncpa [#allocation4], 1 }

</bundles_post_ra>
